<compile_context>
chip_gen: v7x
topology: tpu7x:2x2x1
jax: 0.10.0
libtpu: 0.0.40
codegen_flags: <defaults>
</compile_context>

<pallas_src>
import math
import numpy as np
import jax
import jax.numpy as jnp
from jax.experimental import pallas as pl
from jax.experimental.pallas import tpu as pltpu


def build_pos_encoder(embedding_size: int, max_seq_len: int) -> jnp.ndarray:
    """Vectorized reproduction of the PyTorch __init__ buffer (1, L, E)."""
    assert embedding_size % 2 == 0, "reference module requires even embedding_size"
    pos = np.arange(max_seq_len, dtype=np.float64)[:, None]            # (L, 1)
    i = np.arange(0, embedding_size, 2, dtype=np.float64)[None, :]     # (1, E/2)
    pe = np.zeros((max_seq_len, embedding_size), dtype=np.float64)
    pe[:, 0::2] = np.sin(pos / 10000.0 ** (2.0 * i / embedding_size))
    pe[:, 1::2] = np.cos(pos / 10000.0 ** (2.0 * (i + 1.0) / embedding_size))
    return jnp.asarray(pe.astype(np.float32))[None, :, :]              # (1, L, E)


def _pos_enc_kernel(x_ref, pe_ref, o_ref, *, scale):
    # x_ref: (TILE_B, TILE_C), pe_ref: (1, TILE_C) -> broadcast mul-add on VPU.
    o_ref[...] = x_ref[...] * scale + pe_ref[...]


def _pick_col_tile(total_cols: int, row_block: int, itemsize: int,
                   max_tile_bytes: int = 2 * 1024 * 1024) -> int:
    """Largest multiple of 128 dividing total_cols whose (row_block, tile)
    buffer stays under max_tile_bytes; full extent if cols not 128-aligned."""
    if total_cols % 128 != 0:
        return total_cols
    best = 128
    for mult in range(1, total_cols // 128 + 1):
        t = 128 * mult
        if total_cols % t == 0 and row_block * t * itemsize <= max_tile_bytes:
            best = t
    return best


def positional_encoder_forward(x: jnp.ndarray, pos_encoder: jnp.ndarray,
                               embedding_size: int) -> jnp.ndarray:
    """x: (B, S, E); pos_encoder: (1, max_seq_len, E). Returns (B, S, E)."""
    B, S, E = x.shape
    assert E == embedding_size
    L = pos_encoder.shape[1]
    assert S <= L
    scale = float(math.sqrt(embedding_size))
    itemsize = int(jnp.dtype(x.dtype).itemsize)

    C = S * E
    # Lane-dense 2-D view of the input (contiguous reshape, no data movement).
    x2 = x.reshape(B, C)

    # Row (batch) tile: multiple of 8 when possible, otherwise the full extent.
    tile_b = 8 if (B >= 8 and B % 8 == 0) else B
    tile_c = _pick_col_tile(C, tile_b, itemsize)

    if C % 128 == 0:
        # BlockSpec windows the [0, S*E) prefix of the untouched full buffer.
        pe2 = pos_encoder.reshape(1, L * E)
    else:
        # Fallback for awkward shapes: full-extent column block must match.
        pe2 = pos_encoder[:, :S, :].reshape(1, C)

    # Column-tile axis outer, batch-tile axis inner: the PE block index only
    # depends on the outer axis, so it is re-DMA'd once per column tile.
    grid = (C // tile_c, B // tile_b)

    out2 = pl.pallas_call(
        lambda x_ref, pe_ref, o_ref: _pos_enc_kernel(
            x_ref, pe_ref, o_ref, scale=scale),
        out_shape=jax.ShapeDtypeStruct((B, C), x.dtype),
        grid_spec=pltpu.PrefetchScalarGridSpec(
            num_scalar_prefetch=0,
            grid=grid,
            in_specs=[
                pl.BlockSpec((tile_b, tile_c), lambda c, r: (r, c)),
                pl.BlockSpec((1, tile_c), lambda c, r: (0, c)),
            ],
            out_specs=pl.BlockSpec((tile_b, tile_c), lambda c, r: (r, c)),
        ),
        compiler_params=pltpu.CompilerParams(
            dimension_semantics=("parallel", "parallel")),
    )(x2, pe2)

    return out2.reshape(B, S, E)


if __name__ == "__main__":
    embedding_size = 32
    max_seq_len = 16
    batch = 2
    seq = 8

    pos_encoder = build_pos_encoder(embedding_size, max_seq_len)

    key = jax.random.PRNGKey(0)
    x = jax.random.normal(key, (batch, seq, embedding_size), dtype=jnp.float32)

    out = positional_encoder_forward(x, pos_encoder, embedding_size)
    out = jax.block_until_ready(out)

    # Reference check in plain JAX.
    ref = x * math.sqrt(embedding_size) + pos_encoder[:, :seq]
    np.testing.assert_allclose(np.asarray(out), np.asarray(ref),
                               rtol=1e-6, atol=1e-6)

    print("KERNEL_OK")
</pallas_src>

<mosaic_0001>
module attributes {stable_mosaic.version = 11 : i64} {
  func.func @_lambda_(%arg0: i32, %arg1: i32, %arg2: memref<2x256xf32, #tpu.memory_space<vmem>>, %arg3: memref<1x256xf32, #tpu.memory_space<vmem>>, %arg4: memref<2x256xf32, #tpu.memory_space<vmem>>) attributes {dimension_semantics = [#tpu.dimension_semantics<parallel>, #tpu.dimension_semantics<parallel>], iteration_bounds = array<i64: 1, 1>, scalar_prefetch = 0 : i64, scratch_operands = 0 : i64, tpu.core_type = #tpu.core_type<tc>, window_params = [{transform_indices = @transform_0, window_bounds = array<i64: 2, 256>}, {transform_indices = @transform_1, window_bounds = array<i64: 1, 256>}, {transform_indices = @transform_2, window_bounds = array<i64: 2, 256>}]} {
    %c0 = arith.constant 0 : index
    %c0_0 = arith.constant 0 : index
    %0 = vector.load %arg2[%c0, %c0_0] : memref<2x256xf32, #tpu.memory_space<vmem>>, vector<2x256xf32>
    %cst = arith.constant 5.65685415 : f32
    %1 = vector.broadcast %cst : f32 to vector<2x256xf32>
    %2 = arith.mulf %0, %1 : vector<2x256xf32>
    %c0_1 = arith.constant 0 : index
    %c0_2 = arith.constant 0 : index
    %3 = vector.load %arg3[%c0_1, %c0_2] : memref<1x256xf32, #tpu.memory_space<vmem>>, vector<1x256xf32>
    %4 = vector.broadcast %3 : vector<1x256xf32> to vector<2x256xf32>
    %5 = arith.addf %2, %4 : vector<2x256xf32>
    %c0_3 = arith.constant 0 : index
    %c0_4 = arith.constant 0 : index
    %6 = vector.load %arg4[%c0_3, %c0_4] : memref<2x256xf32, #tpu.memory_space<vmem>>, vector<2x256xf32>
    tpu.vector_store %arg4[%c0_3, %c0_4], %5 {strides = array<i32>} : memref<2x256xf32, #tpu.memory_space<vmem>>, vector<2x256xf32>,
    return
  }
  func.func @transform_0(%arg0: i32, %arg1: i32) -> (i32, i32) {
    %c0_i32 = arith.constant 0 : i32
    return %arg1, %arg0 : i32, i32
  }
  func.func @transform_1(%arg0: i32, %arg1: i32) -> (i32, i32) {
    %c0_i32 = arith.constant 0 : i32
    %c0_i32_0 = arith.constant 0 : i32
    return %c0_i32, %arg0 : i32, i32
  }
  func.func @transform_2(%arg0: i32, %arg1: i32) -> (i32, i32) {
    %c0_i32 = arith.constant 0 : i32
    return %arg1, %arg0 : i32, i32
  }
}

</mosaic_0001>

<bundles_post_ra>
// kernel: tpu_custom_call.1
= control target key start
LH: loop header
LB: loop body
LE: loop exit
PB: predicated region body
PF: predicated region fallthrough
CT: control target
= control target key end

     0   :  { %7 = vsyncpa [#allocation3], 0  ;;  %s216_s0 = inlined_call_operand.hbm [shape: f32[2,256], index: 0, kind: input, shape index: {}]   ;;  %s217_s1 = inlined_call_operand.hbm [shape: f32[1,512], index: 1, kind: input, shape index: {}]   ;;  %s218_s2 = inlined_call_operand.hbm [shape: f32[2,256], index: 2, kind: output, shape index: {}]  }
   0x1   :  { %8 = vsyncpa [#allocation6], 0 }
   0x2   :  { %9 = vsyncpa [#allocation4], 0  ;;  %s151_s9 = smov [#allocation2]   ;;  %s152_s11 = smov [#allocation5]  }
   0x3   :  { %s16_s10 = sshll.u32 %s151_s9, 4  ;;  %s26_s12 = sshll.u32 %s152_s11, 4  ;;  %s17_s10 = int_to_ptr.vmem [resolvable:$true] %s16_s10  ;;  %s170_s12 = int_to_ptr.vmem [resolvable:$true] %s26_s12 }
   0x4   :  { %s79_s15 = scalar_lea.hbm %s216_s0, 64 }
   0x5   :  { %p80_p0 = scmp.ne.s32.totalorder %s216_s0, %s79_s15  ;;  %p83_p1 = scmp.lt.u32.totalorder %s79_s15, %s216_s0 }
   0x7   :  { %p85_p2 = pnand %p83_p1, %p80_p0 }
   0x9   :  { %88 = shalt.err (!%p85_p2)
}
   0xa   :  { %s89_s20 = scalar_lea.vmem %s17_s10, 64  ;;  %p94_p4 = scmp.lt.s32.totalorder %s17_s10, %s17_s10 }
   0xb   :  { %p90_p3 = scmp.ne.s32.totalorder %s17_s10, %s89_s20  ;;  %p95_p5 = scmp.lt.s32.totalorder %s89_s20, %s89_s20 }
   0xd   :  { %p96_p6 = por %p95_p5, %p94_p4 }
   0xf   :  { %p97_p7 = pnand %p96_p6, %p90_p3 }
  0x11   :  { %100 = shalt.err (!%p97_p7)
}
  0x12   :  { %19 = dma.hbm_to_vmem [thread:$0]  %s216_s0, 64, %s17_s10, [#allocation3]  }
  0x13   :  { %s101_s25 = scalar_lea.hbm %s217_s1, 32  ;;  %s103_s30 = scalar_lea.hbm %s217_s1, 64 }
  0x14   :  { %p102_p8 = scmp.ne.s32.totalorder %s217_s1, %s101_s25  ;;  %p104_p9 = scmp.lt.u32.totalorder %s103_s30, %s101_s25 }
  0x15   :  { %p105_p10 = scmp.lt.u32.totalorder %s101_s25, %s217_s1 }
  0x17   :  { %p106_p11 = por %p105_p10, %p104_p9 }
  0x19   :  { %p107_p12 = pnand %p106_p11, %p102_p8 }
  0x1b   :  { %110 = shalt.err (!%p107_p12)
}
  0x1c   :  { %s111_s0 = scalar_lea.vmem %s170_s12, 32  ;;  %p116_p0 = scmp.lt.s32.totalorder %s170_s12, %s170_s12 }
  0x1d   :  { %p112_p13 = scmp.ne.s32.totalorder %s170_s12, %s111_s0  ;;  %p117_p1 = scmp.lt.s32.totalorder %s111_s0, %s111_s0 }
  0x1f   :  { %p118_p2 = por %p117_p1, %p116_p0 }
  0x21   :  { %p119_p3 = pnand %p118_p2, %p112_p13 }
  0x23   :  { %122 = shalt.err (!%p119_p3)
}
  0x24   :  { %29 = dma.hbm_to_vmem [thread:$0]  %s217_s1, 32, %s170_s12, [#allocation6]  }
  0x25   :  { %145 = dma.done.wait [#allocation3], 64  }
  0x26   :  { %146 = vsyncadd [#allocation3], 4294967232 }
  0x27   :  { %147 = dma.done.wait [#allocation6], 32  }
  0x28   :  { %148 = vsyncadd [#allocation6], 4294967264  ;;  %v40_v0 = vlaneseq  ;;  %v153_v1 = vmov 1983009808   ;;  %v36_v7 = vld [vmem:[#allocation2] sm:$0xf] }
  0x29   :  { %v50_v2 = vunpack.c.l.s4 %v153_v1  ;;  %v38_v8 = vld [vmem:[#allocation5] sm:$0x3]  ;;  %v37_v12 = vmul.f32 5.656854, %v36_v7  ;;  %s154_s7 = smov [#allocation7]  }
  0x2a   :  { %v41_v3 = vshrl.u32 %v40_v0, 7  ;;  %s65_s1 = sshll.u32 %s154_s7, 4  ;;  %s66_s1 = int_to_ptr.vmem [resolvable:$true] %s65_s1 }
  0x2b   :  { %v51_v6 = vunpack.c.0.s8 %v50_v2  ;;  %s123_s8 = scalar_lea.vmem %s66_s1, 64  ;;  %p128_p5 = scmp.lt.s32.totalorder %s66_s1, %s66_s1 }
  0x2c   :  { %v42_v4 = vsub.s32 0, %v41_v3  ;;  %v46_v5 = vsub.s32 1, %v41_v3  ;;  %p124_p4 = scmp.ne.s32.totalorder %s66_s1, %s123_s8  ;;  %p129_p6 = scmp.lt.s32.totalorder %s123_s8, %s123_s8 }
  0x2d   :  { %v54_v11 = vsub.s32 %v51_v6, %v41_v3 }
  0x2e   :  { %v43_v9 = vrot.slane %v38_v8, %v42_v4  ;;  %v47_v10 = vrot.slane %v38_v8, %v46_v5  ;;  %p130_p7 = por %p129_p6, %p128_p5 }
  0x30   :  { %v48_v13 = vcombine.low %v43_v9, %v47_v10  ;;  %p131_p8 = pnand %p130_p7, %p124_p4 }
  0x32   :  { %v55_v14 = vrot.slane %v48_v13, %v54_v11 }
  0x34   :  { %v57_v15 = vadd.f32 %v55_v14, %v37_v12 }
  0x36   :  { %58 = vst [vmem:[#allocation7] sm:$0xf] %v57_v15 }
  0x37   :  { %134 = shalt.err (!%p131_p8)
}
  0x38   :  { %s135_s11 = scalar_lea.hbm %s218_s2, 64 }
  0x39   :  { %p136_p9 = scmp.ne.s32.totalorder %s218_s2, %s135_s11  ;;  %p139_p10 = scmp.lt.u32.totalorder %s135_s11, %s218_s2 }
  0x3b   :  { %p141_p11 = pnand %p139_p10, %p136_p9 }
  0x3d   :  { %144 = shalt.err (!%p141_p11)
}
  0x3e   :  { %68 = dma.vmem_to_hbm [thread:$0]  %s66_s1, 64, %s218_s2, [#allocation4]  }
  0x3f   :  { %149 = dma.done.wait [#allocation4], 64  }
  0x40   :  { %150 = vsyncadd [#allocation4], 4294967232 }
  0x41   :  { %72 = vsyncpa [#allocation3], 1 }
  0x42   :  { %73 = vsyncpa [#allocation6], 1 }
  0x43   :  { %74 = vsyncpa [#allocation4], 1 }

</bundles_post_ra>
